<compile_context>
chip_gen: v7x
topology: tpu7x:2x2x1
jax: 0.10.0
libtpu: 0.0.40
codegen_flags: <defaults>
</compile_context>

<pallas_src>
import functools
import math

import jax
import jax.numpy as jnp
from jax import lax
from jax.experimental import pallas as pl
from jax.experimental.pallas import tpu as pltpu


def _round_up(x, m):
    return (x + m - 1) // m * m


def _final_layer_kernel(x_ref, w_ref, b_ref, o_ref, *, hidden_dim, pad_lanes,
                        eps, matmul_dtype):
    # x_ref: (tm, Hp)   tokens (lane-padded with zeros past hidden_dim if needed)
    # w_ref: (Hp, OUTp) folded weight W' = diag(gamma) @ W, matmul_dtype, zero pad rows/cols
    # b_ref: (1, OUTp)  folded bias  b' = beta @ W + b, f32, zero padded lanes
    # o_ref: (tm, OUTp)
    x = x_ref[...].astype(jnp.float32)
    inv_h = 1.0 / float(hidden_dim)

    mean = jnp.sum(x, axis=-1, keepdims=True) * inv_h
    centered = x - mean
    sq = jnp.sum(centered * centered, axis=-1, keepdims=True)
    if pad_lanes:
        # Padded lanes hold exact zeros, so centered == -mean there and they
        # contribute pad_lanes * mean^2 to sum(centered^2).  Subtracting it is an
        # exact correction and avoids an iota + select pass over the tile.
        sq = sq - float(pad_lanes) * (mean * mean)
    inv_std = lax.rsqrt(sq * inv_h + eps)
    xn = centered * inv_std  # padded lanes hit zero rows of W' -> no contribution

    # Projection: bf16 inputs, f32 accumulation on the MXU.
    y = jnp.dot(xn.astype(matmul_dtype), w_ref[...],
                preferred_element_type=jnp.float32) + b_ref[...]
    o_ref[...] = y.astype(o_ref.dtype)


def prepare_final_layer_params(gamma, beta, w, b, *, matmul_dtype=jnp.bfloat16):
    """One-time parameter prep: fold LN affine into the projection, pad, cast.

    w: (H, OUT) (already transposed vs torch's (OUT, H) Linear weight).
    Returns (w_p, b_p, H, OUT): w_p (Hp, OUTp) in matmul_dtype, b_p (1, OUTp) f32.
    Pay this once per model, not per forward call.
    """
    H, OUT = w.shape
    Hp = _round_up(H, 128)
    OUTp = _round_up(OUT, 128)
    w32 = w.astype(jnp.float32)
    w_fold = gamma.astype(jnp.float32)[:, None] * w32                 # diag(gamma) @ W
    b_fold = beta.astype(jnp.float32) @ w32 + b.astype(jnp.float32)   # beta @ W + b
    w_p = jnp.pad(w_fold, ((0, Hp - H), (0, OUTp - OUT))).astype(matmul_dtype)
    b_p = jnp.pad(b_fold, (0, OUTp - OUT)).reshape(1, OUTp)
    return w_p, b_p, H, OUT


def final_layer_apply(x, w_p, b_p, hidden_dim, out_dim, *, eps=1e-5, tm=512,
                      matmul_dtype=jnp.bfloat16):
    """FinalLayer forward with pre-prepared (folded/padded/cast) parameters.

    x: (..., hidden_dim).  tm: row tile over flattened tokens (sweep 512/1024 on
    v5e/v6e; v7x is auto-reduced against its 64 MiB VMEM if needed).
    """
    orig_shape = x.shape
    H = orig_shape[-1]
    assert H == hidden_dim, (H, hidden_dim)
    Hp, OUTp = w_p.shape
    OUT = out_dim
    M = math.prod(orig_shape[:-1])
    x2d = x.reshape(M, H)

    # Lane-pad x only when hidden_dim is not already a multiple of 128.
    pad_lanes = Hp - H
    if pad_lanes:
        x2d = jnp.pad(x2d, ((0, 0), (0, pad_lanes)))

    # No row padding: grid = cdiv(M, tm); the partial trailing block is handled by
    # masked OOB stores (per-row LN keeps garbage tail rows contained).
    tm_eff = min(tm, _round_up(M, 8))

    x_bytes = jnp.dtype(x.dtype).itemsize
    w_bytes = jnp.dtype(matmul_dtype).itemsize

    # Generation-aware VMEM cap: ~50 MiB on v7x (64 MiB physical), ~100 MiB on
    # v5e/v6e (128 MiB physical).
    try:
        phys_vmem = int(pltpu.get_tpu_info().vmem_capacity_bytes)
    except Exception:
        phys_vmem = 64 * 1024 * 1024  # conservative: assume v7x
    vmem_cap = 100 * 1024 * 1024 if phys_vmem >= 128 * 1024 * 1024 else 50 * 1024 * 1024

    def vmem_estimate(rows, w_bufs):
        return (2 * rows * Hp * x_bytes        # double-buffered x tiles
                + 2 * rows * OUTp * x_bytes    # double-buffered out tiles
                + 4 * rows * Hp * 4            # LN f32 intermediates (x_f32/centered/xn/cast)
                + w_bufs * Hp * OUTp * w_bytes # resident folded weight
                + w_bufs * OUTp * 4)           # resident folded bias

    # Re-derive the row tile against the per-generation cap (matters on v7x / huge Hp).
    while tm_eff > 8 and int(1.5 * vmem_estimate(tm_eff, 2)) > vmem_cap:
        tm_eff = max(8, _round_up(tm_eff // 2, 8))

    grid = (pl.cdiv(M, tm_eff),)

    cost = pl.CostEstimate(
        flops=2 * M * H * OUT + 8 * M * H,
        transcendentals=M,
        bytes_accessed=(M * H * x_bytes + M * OUT * x_bytes
                        + Hp * OUTp * w_bytes + OUTp * 4),
    )

    def build_and_run(single_buffer_params):
        if single_buffer_params:
            param_kw = dict(pipeline_mode=pl.Buffered(1))  # grid-invariant operands
            w_bufs = 1
        else:
            param_kw = {}
            w_bufs = 2
        vmem_limit = int(min(max(int(1.5 * vmem_estimate(tm_eff, w_bufs)),
                                 32 * 1024 * 1024), vmem_cap))
        # TODO(synk): if an xprof trace shows exposed DMA between row tiles, sweep
        # pipeline_mode=pl.Buffered(3) on the x input spec.
        return pl.pallas_call(
            functools.partial(_final_layer_kernel, hidden_dim=H,
                              pad_lanes=pad_lanes, eps=eps,
                              matmul_dtype=matmul_dtype),
            out_shape=jax.ShapeDtypeStruct((M, OUTp), x.dtype),
            grid_spec=pltpu.PrefetchScalarGridSpec(
                num_scalar_prefetch=0,
                grid=grid,
                in_specs=[
                    pl.BlockSpec((tm_eff, Hp), lambda i: (i, 0)),
                    pl.BlockSpec((Hp, OUTp), lambda i: (0, 0), **param_kw),
                    pl.BlockSpec((1, OUTp), lambda i: (0, 0), **param_kw),
                ],
                out_specs=pl.BlockSpec((tm_eff, OUTp), lambda i: (i, 0)),
            ),
            compiler_params=pltpu.CompilerParams(
                dimension_semantics=("parallel",),
                vmem_limit_bytes=vmem_limit,
            ),
            cost_estimate=cost,
        )(x2d, w_p, b_p)

    try:
        out_p = build_and_run(True)
    except Exception:
        # pl.Buffered(1) not supported by this JAX version: fall back to the
        # default double-buffered grid-invariant operands.
        out_p = build_and_run(False)

    out = out_p if OUTp == OUT else out_p[:, :OUT]
    return out.reshape(*orig_shape[:-1], OUT)


def final_layer_pallas(x, gamma, beta, w, b, *, eps=1e-5, tm=512,
                       matmul_dtype=jnp.bfloat16):
    """Convenience wrapper: prepares params and applies (prefer preparing once)."""
    w_p, b_p, H, OUT = prepare_final_layer_params(gamma, beta, w, b,
                                                  matmul_dtype=matmul_dtype)
    return final_layer_apply(x, w_p, b_p, H, OUT, eps=eps, tm=tm,
                             matmul_dtype=matmul_dtype)


def init_final_layer_params(key, hidden_dim, out_dim, dtype=jnp.float32):
    # nn.LayerNorm defaults: weight=1, bias=0.  nn.Linear: U(-1/sqrt(fan_in), +).
    kw, kb = jax.random.split(key)
    bound = 1.0 / math.sqrt(hidden_dim)
    w = jax.random.uniform(kw, (hidden_dim, out_dim), dtype=dtype,
                           minval=-bound, maxval=bound)  # stored pre-transposed
    b = jax.random.uniform(kb, (out_dim,), dtype=dtype, minval=-bound, maxval=bound)
    gamma = jnp.ones((hidden_dim,), dtype)
    beta = jnp.zeros((hidden_dim,), dtype)
    return gamma, beta, w, b


def final_layer_reference(x, gamma, beta, w, b, *, eps=1e-5):
    xf = x.astype(jnp.float32)
    mean = jnp.mean(xf, axis=-1, keepdims=True)
    var = jnp.mean((xf - mean) ** 2, axis=-1, keepdims=True)
    xn = (xf - mean) * lax.rsqrt(var + eps) * gamma + beta
    return (xn @ w.astype(jnp.float32) + b).astype(x.dtype)


if __name__ == "__main__":
    B, S = 2, 8
    HIDDEN_DIM, OUT_DIM = 32, 16

    key = jax.random.PRNGKey(0)
    kx, kp = jax.random.split(key)

    x = jax.random.normal(kx, (B, S, HIDDEN_DIM), dtype=jnp.float32)
    gamma, beta, w, b = init_final_layer_params(kp, HIDDEN_DIM, OUT_DIM)

    # One-time parameter prep (fold LN affine, pad, cast) -- paid once, not per call.
    w_p, b_p, _, _ = prepare_final_layer_params(gamma, beta, w, b)

    out = final_layer_apply(x, w_p, b_p, HIDDEN_DIM, OUT_DIM)
    out = jax.block_until_ready(out)

    ref = final_layer_reference(x, gamma, beta, w, b)
    assert out.shape == (B, S, OUT_DIM)
    # bf16 matmul inputs (f32 accumulation) vs full-f32 reference -> relaxed tolerance.
    max_err = float(jnp.max(jnp.abs(out.astype(jnp.float32) - ref)))
    assert max_err < 5e-2, f"mismatch vs reference: max abs err {max_err}"

    # Ragged-M check: small row tile forces a partial trailing block, exercising the
    # masked OOB-store path (no row padding / no row slice).
    x_r = jax.random.normal(jax.random.PRNGKey(1), (5, 4, HIDDEN_DIM), dtype=jnp.float32)
    out_r = jax.block_until_ready(
        final_layer_apply(x_r, w_p, b_p, HIDDEN_DIM, OUT_DIM, tm=8))
    ref_r = final_layer_reference(x_r, gamma, beta, w, b)
    assert out_r.shape == (5, 4, OUT_DIM)
    max_err_r = float(jnp.max(jnp.abs(out_r.astype(jnp.float32) - ref_r)))
    assert max_err_r < 5e-2, f"ragged-M mismatch vs reference: max abs err {max_err_r}"

    print("KERNEL_OK")
</pallas_src>

<mosaic_0001>
module attributes {stable_mosaic.version = 11 : i64} {
  func.func @_final_layer_kernel(%arg0: i32, %arg1: memref<16x128xf32, #tpu.memory_space<vmem>>, %arg2: memref<128x128xbf16, #tpu.memory_space<vmem>>, %arg3: memref<1x128xf32, #tpu.memory_space<vmem>>, %arg4: memref<16x128xf32, #tpu.memory_space<vmem>>) attributes {dimension_semantics = [#tpu.dimension_semantics<parallel>], iteration_bounds = array<i64: 1>, scalar_prefetch = 0 : i64, scratch_operands = 0 : i64, tpu.core_type = #tpu.core_type<tc>, window_params = [{transform_indices = @transform_0, window_bounds = array<i64: 16, 128>}, {pipeline_mode = #tpu.pipeline_mode<synchronous>, transform_indices = @transform_1, window_bounds = array<i64: 128, 128>}, {pipeline_mode = #tpu.pipeline_mode<synchronous>, transform_indices = @transform_2, window_bounds = array<i64: 1, 128>}, {transform_indices = @transform_3, window_bounds = array<i64: 16, 128>}]} {
    %c0 = arith.constant 0 : index
    %c0_0 = arith.constant 0 : index
    %0 = vector.load %arg1[%c0, %c0_0] : memref<16x128xf32, #tpu.memory_space<vmem>>, vector<16x128xf32>
    %cst = arith.constant dense<0.000000e+00> : vector<16xf32>
    %1 = vector.multi_reduction <add>, %0, %cst [1] : vector<16x128xf32> to vector<16xf32>
    %2 = vector.shape_cast %1 : vector<16xf32> to vector<16x1xf32>
    %cst_1 = arith.constant 3.125000e-02 : f32
    %3 = vector.broadcast %cst_1 : f32 to vector<16x1xf32>
    %4 = arith.mulf %2, %3 : vector<16x1xf32>
    %5 = vector.broadcast %4 : vector<16x1xf32> to vector<16x128xf32>
    %6 = arith.subf %0, %5 : vector<16x128xf32>
    %7 = arith.mulf %6, %6 : vector<16x128xf32>
    %cst_2 = arith.constant dense<0.000000e+00> : vector<16xf32>
    %8 = vector.multi_reduction <add>, %7, %cst_2 [1] : vector<16x128xf32> to vector<16xf32>
    %9 = vector.shape_cast %8 : vector<16xf32> to vector<16x1xf32>
    %10 = arith.mulf %4, %4 : vector<16x1xf32>
    %cst_3 = arith.constant 9.600000e+01 : f32
    %11 = vector.broadcast %cst_3 : f32 to vector<16x1xf32>
    %12 = arith.mulf %11, %10 : vector<16x1xf32>
    %13 = arith.subf %9, %12 : vector<16x1xf32>
    %cst_4 = arith.constant 3.125000e-02 : f32
    %14 = vector.broadcast %cst_4 : f32 to vector<16x1xf32>
    %15 = arith.mulf %13, %14 : vector<16x1xf32>
    %cst_5 = arith.constant 9.99999974E-6 : f32
    %16 = vector.broadcast %cst_5 : f32 to vector<16x1xf32>
    %17 = arith.addf %15, %16 : vector<16x1xf32>
    %18 = math.rsqrt %17 : vector<16x1xf32>
    %19 = vector.broadcast %18 : vector<16x1xf32> to vector<16x128xf32>
    %20 = arith.mulf %6, %19 : vector<16x128xf32>
    %21 = arith.truncf %20 : vector<16x128xf32> to vector<16x128xbf16>
    %c0_6 = arith.constant 0 : index
    %c0_7 = arith.constant 0 : index
    %22 = vector.load %arg2[%c0_6, %c0_7] : memref<128x128xbf16, #tpu.memory_space<vmem>>, vector<128x128xbf16>
    %cst_8 = arith.constant dense<0.000000e+00> : vector<16x128xf32>
    %23 = tpu.matmul %21, %22, %cst_8 {dimension_numbers = #tpu.dot_dimension_numbers<[1], [0], [0], [1], [0, 0, 1, 1], [], []>} : vector<16x128xbf16>, vector<128x128xbf16>, vector<16x128xf32> -> vector<16x128xf32>
    %c0_9 = arith.constant 0 : index
    %c0_10 = arith.constant 0 : index
    %24 = vector.load %arg3[%c0_9, %c0_10] : memref<1x128xf32, #tpu.memory_space<vmem>>, vector<1x128xf32>
    %25 = vector.broadcast %24 : vector<1x128xf32> to vector<16x128xf32>
    %26 = arith.addf %23, %25 : vector<16x128xf32>
    %c0_11 = arith.constant 0 : index
    %c0_12 = arith.constant 0 : index
    %27 = vector.load %arg4[%c0_11, %c0_12] : memref<16x128xf32, #tpu.memory_space<vmem>>, vector<16x128xf32>
    tpu.vector_store %arg4[%c0_11, %c0_12], %26 {strides = array<i32>} : memref<16x128xf32, #tpu.memory_space<vmem>>, vector<16x128xf32>,
    return
  }
  func.func @transform_0(%arg0: i32) -> (i32, i32) {
    %c0_i32 = arith.constant 0 : i32
    %c0_i32_0 = arith.constant 0 : i32
    return %arg0, %c0_i32 : i32, i32
  }
  func.func @transform_1(%arg0: i32) -> (i32, i32) {
    %c0_i32 = arith.constant 0 : i32
    %c0_i32_0 = arith.constant 0 : i32
    %c0_i32_1 = arith.constant 0 : i32
    return %c0_i32, %c0_i32_0 : i32, i32
  }
  func.func @transform_2(%arg0: i32) -> (i32, i32) {
    %c0_i32 = arith.constant 0 : i32
    %c0_i32_0 = arith.constant 0 : i32
    %c0_i32_1 = arith.constant 0 : i32
    return %c0_i32, %c0_i32_0 : i32, i32
  }
  func.func @transform_3(%arg0: i32) -> (i32, i32) {
    %c0_i32 = arith.constant 0 : i32
    %c0_i32_0 = arith.constant 0 : i32
    return %arg0, %c0_i32 : i32, i32
  }
}

module attributes {stable_mosaic.version = 11 : i64} {
  func.func @_final_layer_kernel(%arg0: i32, %arg1: memref<16x128xf32, #tpu.memory_space<vmem>>, %arg2: memref<128x128xbf16, #tpu.memory_space<vmem>>, %arg3: memref<1x128xf32, #tpu.memory_space<vmem>>, %arg4: memref<16x128xf32, #tpu.memory_space<vmem>>) attributes {dimension_semantics = [#tpu.dimension_semantics<parallel>], iteration_bounds = array<i64: 1>, scalar_prefetch = 0 : i64, scratch_operands = 0 : i64, tpu.core_type = #tpu.core_type<tc>, window_params = [{transform_indices = @transform_0, window_bounds = array<i64: 16, 128>}, {pipeline_mode = #tpu.pipeline_mode<synchronous>, transform_indices = @transform_1, window_bounds = array<i64: 128, 128>}, {pipeline_mode = #tpu.pipeline_mode<synchronous>, transform_indices = @transform_2, window_bounds = array<i64: 1, 128>}, {transform_indices = @transform_3, window_bounds = array<i64: 16, 128>}]} {
    %c0 = arith.constant 0 : index
    %c0_0 = arith.constant 0 : index
    %0 = vector.load %arg1[%c0, %c0_0] : memref<16x128xf32, #tpu.memory_space<vmem>>, vector<16x128xf32>
    %cst = arith.constant dense<0.000000e+00> : vector<16xf32>
    %1 = vector.multi_reduction <add>, %0, %cst [1] : vector<16x128xf32> to vector<16xf32>
    %2 = vector.shape_cast %1 : vector<16xf32> to vector<16x1xf32>
    %cst_1 = arith.constant 3.125000e-02 : f32
    %3 = vector.broadcast %cst_1 : f32 to vector<16x1xf32>
    %4 = arith.mulf %2, %3 : vector<16x1xf32>
    %5 = vector.broadcast %4 : vector<16x1xf32> to vector<16x128xf32>
    %6 = arith.subf %0, %5 : vector<16x128xf32>
    %7 = arith.mulf %6, %6 : vector<16x128xf32>
    %cst_2 = arith.constant dense<0.000000e+00> : vector<16xf32>
    %8 = vector.multi_reduction <add>, %7, %cst_2 [1] : vector<16x128xf32> to vector<16xf32>
    %9 = vector.shape_cast %8 : vector<16xf32> to vector<16x1xf32>
    %10 = arith.mulf %4, %4 : vector<16x1xf32>
    %cst_3 = arith.constant 9.600000e+01 : f32
    %11 = vector.broadcast %cst_3 : f32 to vector<16x1xf32>
    %12 = arith.mulf %11, %10 : vector<16x1xf32>
    %13 = arith.subf %9, %12 : vector<16x1xf32>
    %cst_4 = arith.constant 3.125000e-02 : f32
    %14 = vector.broadcast %cst_4 : f32 to vector<16x1xf32>
    %15 = arith.mulf %13, %14 : vector<16x1xf32>
    %cst_5 = arith.constant 9.99999974E-6 : f32
    %16 = vector.broadcast %cst_5 : f32 to vector<16x1xf32>
    %17 = arith.addf %15, %16 : vector<16x1xf32>
    %18 = math.rsqrt %17 : vector<16x1xf32>
    %19 = vector.broadcast %18 : vector<16x1xf32> to vector<16x128xf32>
    %20 = arith.mulf %6, %19 : vector<16x128xf32>
    %21 = arith.truncf %20 : vector<16x128xf32> to vector<16x128xbf16>
    %c0_6 = arith.constant 0 : index
    %c0_7 = arith.constant 0 : index
    %22 = vector.load %arg2[%c0_6, %c0_7] : memref<128x128xbf16, #tpu.memory_space<vmem>>, vector<128x128xbf16>
    %cst_8 = arith.constant dense<0.000000e+00> : vector<16x128xf32>
    %23 = tpu.matmul %21, %22, %cst_8 {dimension_numbers = #tpu.dot_dimension_numbers<[1], [0], [0], [1], [0, 0, 1, 1], [], []>} : vector<16x128xbf16>, vector<128x128xbf16>, vector<16x128xf32> -> vector<16x128xf32>
    %c0_9 = arith.constant 0 : index
    %c0_10 = arith.constant 0 : index
    %24 = vector.load %arg3[%c0_9, %c0_10] : memref<1x128xf32, #tpu.memory_space<vmem>>, vector<1x128xf32>
    %25 = vector.broadcast %24 : vector<1x128xf32> to vector<16x128xf32>
    %26 = arith.addf %23, %25 : vector<16x128xf32>
    %c0_11 = arith.constant 0 : index
    %c0_12 = arith.constant 0 : index
    %27 = vector.load %arg4[%c0_11, %c0_12] : memref<16x128xf32, #tpu.memory_space<vmem>>, vector<16x128xf32>
    tpu.vector_store %arg4[%c0_11, %c0_12], %26 {strides = array<i32>} : memref<16x128xf32, #tpu.memory_space<vmem>>, vector<16x128xf32>,
    return
  }
  func.func @transform_0(%arg0: i32) -> (i32, i32) {
    %c0_i32 = arith.constant 0 : i32
    %c0_i32_0 = arith.constant 0 : i32
    return %arg0, %c0_i32 : i32, i32
  }
  func.func @transform_1(%arg0: i32) -> (i32, i32) {
    %c0_i32 = arith.constant 0 : i32
    %c0_i32_0 = arith.constant 0 : i32
    %c0_i32_1 = arith.constant 0 : i32
    return %c0_i32, %c0_i32_0 : i32, i32
  }
  func.func @transform_2(%arg0: i32) -> (i32, i32) {
    %c0_i32 = arith.constant 0 : i32
    %c0_i32_0 = arith.constant 0 : i32
    %c0_i32_1 = arith.constant 0 : i32
    return %c0_i32, %c0_i32_0 : i32, i32
  }
  func.func @transform_3(%arg0: i32) -> (i32, i32) {
    %c0_i32 = arith.constant 0 : i32
    %c0_i32_0 = arith.constant 0 : i32
    return %arg0, %c0_i32 : i32, i32
  }
}

</mosaic_0001>

<bundles_post_ra>
// kernel: tpu_custom_call.1
= control target key start
LH: loop header
LB: loop body
LE: loop exit
PB: predicated region body
PF: predicated region fallthrough
CT: control target
= control target key end

     0   :  { %8 = vsyncpa [#allocation3], 0  ;;  %s412_s0 = inlined_call_operand.hbm [shape: f32[16,128], index: 0, kind: input, shape index: {}]   ;;  %s413_s1 = inlined_call_operand.hbm [shape: bf16[128,128], index: 1, kind: input, shape index: {}]   ;;  %s414_s2 = inlined_call_operand.vmem [shape: f32[1,128], index: 2, kind: input, shape index: {}]   ;;  %s415_s3 = inlined_call_operand.hbm [shape: f32[16,128], index: 3, kind: output, shape index: {}]  }
   0x1   :  { %9 = vsyncpa [#allocation6], 0 }
   0x2   :  { %10 = vsyncpa [#allocation4], 0  ;;  %s338_s12 = smov [#allocation2]   ;;  %s266_s16 = scalar_lea.hbm %s412_s0, 256 }
   0x3   :  { %s16_s13 = sshll.u32 %s338_s12, 4  ;;  %p267_p0 = scmp.ne.s32.totalorder %s412_s0, %s266_s16  ;;  %s17_s13 = int_to_ptr.vmem [resolvable:$true] %s16_s13 }
   0x4   :  { %p270_p1 = scmp.lt.u32.totalorder %s266_s16, %s412_s0 }
   0x6   :  { %p272_p2 = pnand %p270_p1, %p267_p0 }
   0x8   :  { %275 = shalt.err (!%p272_p2)
}
   0x9   :  { %s276_s21 = scalar_lea.vmem %s17_s13, 256  ;;  %p281_p4 = scmp.lt.s32.totalorder %s17_s13, %s17_s13 }
   0xa   :  { %p277_p3 = scmp.ne.s32.totalorder %s17_s13, %s276_s21  ;;  %p282_p5 = scmp.lt.s32.totalorder %s276_s21, %s276_s21 }
   0xc   :  { %p283_p6 = por %p282_p5, %p281_p4 }
   0xe   :  { %p284_p7 = pnand %p283_p6, %p277_p3 }
  0x10   :  { %287 = shalt.err (!%p284_p7)
}
  0x11   :  { %s339_s22 = smov 128   ;;  %s340_s23 = smov 8  }
  0x12   :  { %22 = dma.hbm_to_vmem [thread:$0]  %s412_s0, 256, %s17_s13, [#allocation3], %s339_s22, %s339_s22, %s340_s23  }
  0x13   :  { %s341_s26 = smov [#allocation5]   ;;  %s288_s30 = scalar_lea.hbm %s413_s1, 1024 }
  0x14   :  { %s28_s27 = sshll.u32 %s341_s26, 4  ;;  %p289_p8 = scmp.ne.s32.totalorder %s413_s1, %s288_s30  ;;  %s29_s27 = int_to_ptr.vmem [resolvable:$true] %s28_s27 }
  0x15   :  { %p292_p9 = scmp.lt.u32.totalorder %s288_s30, %s413_s1 }
  0x17   :  { %p294_p10 = pnand %p292_p9, %p289_p8 }
  0x19   :  { %297 = shalt.err (!%p294_p10)
}
  0x1a   :  { %s298_s8 = scalar_lea.vmem %s29_s27, 1024  ;;  %p303_p12 = scmp.lt.s32.totalorder %s29_s27, %s29_s27 }
  0x1b   :  { %p299_p11 = scmp.ne.s32.totalorder %s29_s27, %s298_s8  ;;  %p304_p13 = scmp.lt.s32.totalorder %s298_s8, %s298_s8 }
  0x1d   :  { %p305_p0 = por %p304_p13, %p303_p12 }
  0x1f   :  { %p306_p1 = pnand %p305_p0, %p299_p11 }
  0x21   :  { %309 = shalt.err (!%p306_p1)
}
  0x22   :  { %s342_s0 = smov 64   ;;  %s343_s9 = smov 4  }
  0x23   :  { %34 = dma.hbm_to_vmem [thread:$0]  %s413_s1, 1024, %s29_s27, [#allocation6], %s342_s0, %s342_s0, %s343_s9  }
  0x24   :  { %332 = dma.done.wait [#allocation3], 256  }
  0x25   :  { %333 = vsyncadd [#allocation3], 4294967040 }
  0x26   :  { %334 = dma.done.wait [#allocation6], 1024  }
  0x27   :  { %335 = vsyncadd [#allocation6], 4294966272  ;;  %v44_v0 = vld [vmem:[#allocation2] sm:$0xff]  ;;  %v45_v1 = vld [vmem:[#allocation2 + $0x8] sm:$0xff]  ;;  %v344_v3 = vmov 0.0   ;;  %vm345_vm0 = vmmov 0  }
  0x28   :  { %46 = vadd.xlane.f32.xlu0 %v44_v0  ;;  %v254_v2 = vld [vmem:[#allocation5] sm:$0xff]   ;;  %225 = vmatprep.subr.bf16.mxu0 %v344_v3  ;;  %v255_v4 = vld [vmem:[#allocation5 + $0x8] sm:$0xff]   ;;  %v256_v13 = vld [vmem:[#allocation5 + $0x10] sm:$0xff]   ;;  %s346_s13 = smov [#allocation7]  }
  0x29   :  { %226 = vmatpush3.bf16.msra.mxu0 %v254_v2  ;;  %v257_v14 = vld [vmem:[#allocation5 + $0x18] sm:$0xff]   ;;  %v258_v15 = vld [vmem:[#allocation5 + $0x20] sm:$0xff]   ;;  %v259_v16 = vld [vmem:[#allocation5 + $0x28] sm:$0xff]   ;;  %241 = vmatprep.mubr.msk.bf16.mxu0 %vm345_vm0, %v344_v3  ;;  %s194_s14 = sshll.u32 %s346_s13, 4  ;;  %s195_s14 = int_to_ptr.vmem [resolvable:$true] %s194_s14 }
  0x2a   :  { %227 = vmatprep.subr.bf16.mxu0 %v344_v3  ;;  %v260_v17 = vld [vmem:[#allocation5 + $0x30] sm:$0xff]   ;;  %v261_v18 = vld [vmem:[#allocation5 + $0x38] sm:$0xff]   ;;  %s310_s15 = scalar_lea.vmem %s195_s14, 256  ;;  %p315_p3 = scmp.lt.s32.totalorder %s195_s14, %s195_s14 }
  0x2b   :  { %v207_v36 = vld [vmem:[%s414_s2] ss:$0 sm:$0xff]  ;;  %p311_p2 = scmp.ne.s32.totalorder %s195_s14, %s310_s15  ;;  %p316_p4 = scmp.lt.s32.totalorder %s310_s15, %s310_s15 }
  0x2c   :  { %48 = vadd.xlane.f32.xlu0 %v45_v1 }
  0x2d   :  { %228 = vmatpush3.bf16.msra.mxu0 %v255_v4  ;;  %p317_p5 = por %p316_p4, %p315_p3 }
  0x2e   :  { %229 = vmatprep.subr.bf16.mxu0 %v344_v3 }
  0x2f   :  { %p318_p6 = pnand %p317_p5, %p311_p2 }
  0x31   :  { %230 = vmatpush3.bf16.msra.mxu0 %v256_v13 }
  0x32   :  { %231 = vmatprep.subr.bf16.mxu0 %v344_v3 }
  0x35   :  { %232 = vmatpush3.bf16.msra.mxu0 %v257_v14 }
  0x36   :  { %233 = vmatprep.subr.bf16.mxu0 %v344_v3 }
  0x39   :  { %234 = vmatpush3.bf16.msra.mxu0 %v258_v15 }
  0x3a   :  { %235 = vmatprep.subr.bf16.mxu0 %v344_v3 }
  0x3d   :  { %236 = vmatpush3.bf16.msra.mxu0 %v259_v16 }
  0x3e   :  { %237 = vmatprep.subr.bf16.mxu0 %v344_v3 }
  0x41   :  { %238 = vmatpush3.bf16.msra.mxu0 %v260_v17 }
  0x42   :  { %239 = vmatprep.subr.bf16.mxu0 %v344_v3 }
  0x45   :  { %240 = vmatpush3.bf16.msra.mxu0 %v261_v18 }
  0xb5   :  { %v47_v5 = vpop.xlane.xlu0 %46 }
  0xb6   :  { %v50_v6 = vmul.f32 0.03125, %v47_v5 }
  0xb8   :  { %v52_v7 = vsub.f32 %v44_v0, %v50_v6  ;;  %v60_v19 = vmul.f32 %v50_v6, %v50_v6 }
  0xb9   :  { %v49_v8 = vpop.xlane.xlu0 %48 }
  0xba   :  { %v51_v9 = vmul.f32 0.03125, %v49_v8  ;;  %v54_v10 = vmul.f32 %v52_v7, %v52_v7  ;;  %v62_v21 = vmul.f32 96.0, %v60_v19 }
  0xbc   :  { %v53_v11 = vsub.f32 %v45_v1, %v51_v9  ;;  %56 = vadd.xlane.f32.xlu1 %v54_v10  ;;  %v61_v20 = vmul.f32 %v51_v9, %v51_v9 }
  0xbe   :  { %v55_v12 = vmul.f32 %v53_v11, %v53_v11  ;;  %v63_v24 = vmul.f32 96.0, %v61_v20 }
  0xc0   :  { %58 = vadd.xlane.f32.xlu1 %v55_v12 }
 0x149   :  { %v57_v22 = vpop.xlane.xlu1 %56 }
 0x14a   :  { %v64_v23 = vsub.f32 %v57_v22, %v62_v21 }
 0x14c   :  { %v66_v25 = vmul.f32 0.03125, %v64_v23 }
 0x14d   :  { %v59_v26 = vpop.xlane.xlu1 %58 }
 0x14e   :  { %v68_v27 = vadd.f32 1e-05, %v66_v25  ;;  %v65_v28 = vsub.f32 %v59_v26, %v63_v24 }
 0x150   :  { %v67_v29 = vmul.f32 0.03125, %v65_v28  ;;  %262 = vrsqrt.f32 %v68_v27 }
 0x152   :  { %v69_v30 = vadd.f32 1e-05, %v67_v29 }
 0x154   :  { %264 = vrsqrt.f32 %v69_v30 }
 0x15a   :  { %v263_v31 = vpop.eup %262 }
 0x15b   :  { %v72_v33 = vmul.f32 %v263_v31, %v52_v7 }
 0x15e   :  { %v265_v32 = vpop.eup %264 }
 0x15f   :  { %v73_v34 = vmul.f32 %v265_v32, %v53_v11 }
 0x161   :  { %v74_v35 = vpack.c.bf16 %v73_v34, %v72_v33 }
 0x163   :  { %242 = vmatmul.mubr.bf16.vlgmr.msra.gmra.mrb[0].mxu0 %v74_v35 }
 0x236   :  { %v180_v37 = vpop.f32.mrb[0].mxu0 }
 0x237   :  { %v181_v38 = vadd.f32 %v207_v36, %v180_v37  ;;  %v243_v39 = vpop.f32.mrb[1].mxu0 }
 0x238   :  { %v183_v40 = vpop.f32.mrb[2].mxu0 }
 0x239   :  { %187 = vst [vmem:[#allocation7] sm:$0xff] %v181_v38  ;;  %v184_v41 = vadd.f32 %v207_v36, %v183_v40  ;;  %v244_v42 = vpop.f32.mrb[3].mxu0 }
 0x23b   :  { %188 = vst [vmem:[#allocation7 + $0x8] sm:$0xff] %v184_v41 }
 0x23c   :  { %321 = shalt.err (!%p318_p6)
}
 0x23d   :  { %s322_s17 = scalar_lea.hbm %s415_s3, 256 }
 0x23e   :  { %p323_p7 = scmp.ne.s32.totalorder %s415_s3, %s322_s17  ;;  %p326_p8 = scmp.lt.u32.totalorder %s322_s17, %s415_s3 }
 0x240   :  { %p328_p9 = pnand %p326_p8, %p323_p7 }
 0x242   :  { %331 = shalt.err (!%p328_p9)
}
 0x243   :  { %200 = dma.vmem_to_hbm [thread:$0]  %s195_s14, 256, %s415_s3, [#allocation4], %s339_s22, %s339_s22, %s340_s23  }
 0x244   :  { %336 = dma.done.wait [#allocation4], 256  }
 0x245   :  { %337 = vsyncadd [#allocation4], 4294967040 }
 0x246   :  { %204 = vsyncpa [#allocation3], 1 }
 0x247   :  { %205 = vsyncpa [#allocation6], 1 }
 0x248   :  { %206 = vsyncpa [#allocation4], 1 }

// kernel: tpu_custom_call.1
= control target key start
LH: loop header
LB: loop body
LE: loop exit
PB: predicated region body
PF: predicated region fallthrough
CT: control target
= control target key end

     0   :  { %8 = vsyncpa [#allocation3], 0  ;;  %s412_s0 = inlined_call_operand.hbm [shape: f32[16,128], index: 0, kind: input, shape index: {}]   ;;  %s413_s1 = inlined_call_operand.hbm [shape: bf16[128,128], index: 1, kind: input, shape index: {}]   ;;  %s414_s2 = inlined_call_operand.vmem [shape: f32[1,128], index: 2, kind: input, shape index: {}]   ;;  %s415_s3 = inlined_call_operand.hbm [shape: f32[16,128], index: 3, kind: output, shape index: {}]  }
   0x1   :  { %9 = vsyncpa [#allocation6], 0 }
   0x2   :  { %10 = vsyncpa [#allocation4], 0  ;;  %s338_s12 = smov [#allocation2]   ;;  %s266_s16 = scalar_lea.hbm %s412_s0, 256 }
   0x3   :  { %s16_s13 = sshll.u32 %s338_s12, 4  ;;  %p267_p0 = scmp.ne.s32.totalorder %s412_s0, %s266_s16  ;;  %s17_s13 = int_to_ptr.vmem [resolvable:$true] %s16_s13 }
   0x4   :  { %p270_p1 = scmp.lt.u32.totalorder %s266_s16, %s412_s0 }
   0x6   :  { %p272_p2 = pnand %p270_p1, %p267_p0 }
   0x8   :  { %275 = shalt.err (!%p272_p2)
}
   0x9   :  { %s276_s21 = scalar_lea.vmem %s17_s13, 256  ;;  %p281_p4 = scmp.lt.s32.totalorder %s17_s13, %s17_s13 }
   0xa   :  { %p277_p3 = scmp.ne.s32.totalorder %s17_s13, %s276_s21  ;;  %p282_p5 = scmp.lt.s32.totalorder %s276_s21, %s276_s21 }
   0xc   :  { %p283_p6 = por %p282_p5, %p281_p4 }
   0xe   :  { %p284_p7 = pnand %p283_p6, %p277_p3 }
  0x10   :  { %287 = shalt.err (!%p284_p7)
}
  0x11   :  { %s339_s22 = smov 128   ;;  %s340_s23 = smov 8  }
  0x12   :  { %22 = dma.hbm_to_vmem [thread:$0]  %s412_s0, 256, %s17_s13, [#allocation3], %s339_s22, %s339_s22, %s340_s23  }
  0x13   :  { %s341_s26 = smov [#allocation5]   ;;  %s288_s30 = scalar_lea.hbm %s413_s1, 1024 }
  0x14   :  { %s28_s27 = sshll.u32 %s341_s26, 4  ;;  %p289_p8 = scmp.ne.s32.totalorder %s413_s1, %s288_s30  ;;  %s29_s27 = int_to_ptr.vmem [resolvable:$true] %s28_s27 }
  0x15   :  { %p292_p9 = scmp.lt.u32.totalorder %s288_s30, %s413_s1 }
  0x17   :  { %p294_p10 = pnand %p292_p9, %p289_p8 }
  0x19   :  { %297 = shalt.err (!%p294_p10)
}
  0x1a   :  { %s298_s8 = scalar_lea.vmem %s29_s27, 1024  ;;  %p303_p12 = scmp.lt.s32.totalorder %s29_s27, %s29_s27 }
  0x1b   :  { %p299_p11 = scmp.ne.s32.totalorder %s29_s27, %s298_s8  ;;  %p304_p13 = scmp.lt.s32.totalorder %s298_s8, %s298_s8 }
  0x1d   :  { %p305_p0 = por %p304_p13, %p303_p12 }
  0x1f   :  { %p306_p1 = pnand %p305_p0, %p299_p11 }
  0x21   :  { %309 = shalt.err (!%p306_p1)
}
  0x22   :  { %s342_s0 = smov 64   ;;  %s343_s9 = smov 4  }
  0x23   :  { %34 = dma.hbm_to_vmem [thread:$0]  %s413_s1, 1024, %s29_s27, [#allocation6], %s342_s0, %s342_s0, %s343_s9  }
  0x24   :  { %332 = dma.done.wait [#allocation3], 256  }
  0x25   :  { %333 = vsyncadd [#allocation3], 4294967040 }
  0x26   :  { %334 = dma.done.wait [#allocation6], 1024  }
  0x27   :  { %335 = vsyncadd [#allocation6], 4294966272  ;;  %v44_v0 = vld [vmem:[#allocation2] sm:$0xff]  ;;  %v45_v1 = vld [vmem:[#allocation2 + $0x8] sm:$0xff]  ;;  %v344_v3 = vmov 0.0   ;;  %vm345_vm0 = vmmov 0  }
  0x28   :  { %46 = vadd.xlane.f32.xlu0 %v44_v0  ;;  %v254_v2 = vld [vmem:[#allocation5] sm:$0xff]   ;;  %225 = vmatprep.subr.bf16.mxu0 %v344_v3  ;;  %v255_v4 = vld [vmem:[#allocation5 + $0x8] sm:$0xff]   ;;  %v256_v13 = vld [vmem:[#allocation5 + $0x10] sm:$0xff]   ;;  %s346_s13 = smov [#allocation7]  }
  0x29   :  { %226 = vmatpush3.bf16.msra.mxu0 %v254_v2  ;;  %v257_v14 = vld [vmem:[#allocation5 + $0x18] sm:$0xff]   ;;  %v258_v15 = vld [vmem:[#allocation5 + $0x20] sm:$0xff]   ;;  %v259_v16 = vld [vmem:[#allocation5 + $0x28] sm:$0xff]   ;;  %241 = vmatprep.mubr.msk.bf16.mxu0 %vm345_vm0, %v344_v3  ;;  %s194_s14 = sshll.u32 %s346_s13, 4  ;;  %s195_s14 = int_to_ptr.vmem [resolvable:$true] %s194_s14 }
  0x2a   :  { %227 = vmatprep.subr.bf16.mxu0 %v344_v3  ;;  %v260_v17 = vld [vmem:[#allocation5 + $0x30] sm:$0xff]   ;;  %v261_v18 = vld [vmem:[#allocation5 + $0x38] sm:$0xff]   ;;  %s310_s15 = scalar_lea.vmem %s195_s14, 256  ;;  %p315_p3 = scmp.lt.s32.totalorder %s195_s14, %s195_s14 }
  0x2b   :  { %v207_v36 = vld [vmem:[%s414_s2] ss:$0 sm:$0xff]  ;;  %p311_p2 = scmp.ne.s32.totalorder %s195_s14, %s310_s15  ;;  %p316_p4 = scmp.lt.s32.totalorder %s310_s15, %s310_s15 }
  0x2c   :  { %48 = vadd.xlane.f32.xlu0 %v45_v1 }
  0x2d   :  { %228 = vmatpush3.bf16.msra.mxu0 %v255_v4  ;;  %p317_p5 = por %p316_p4, %p315_p3 }
  0x2e   :  { %229 = vmatprep.subr.bf16.mxu0 %v344_v3 }
  0x2f   :  { %p318_p6 = pnand %p317_p5, %p311_p2 }
  0x31   :  { %230 = vmatpush3.bf16.msra.mxu0 %v256_v13 }
  0x32   :  { %231 = vmatprep.subr.bf16.mxu0 %v344_v3 }
  0x35   :  { %232 = vmatpush3.bf16.msra.mxu0 %v257_v14 }
  0x36   :  { %233 = vmatprep.subr.bf16.mxu0 %v344_v3 }
  0x39   :  { %234 = vmatpush3.bf16.msra.mxu0 %v258_v15 }
  0x3a   :  { %235 = vmatprep.subr.bf16.mxu0 %v344_v3 }
  0x3d   :  { %236 = vmatpush3.bf16.msra.mxu0 %v259_v16 }
  0x3e   :  { %237 = vmatprep.subr.bf16.mxu0 %v344_v3 }
  0x41   :  { %238 = vmatpush3.bf16.msra.mxu0 %v260_v17 }
  0x42   :  { %239 = vmatprep.subr.bf16.mxu0 %v344_v3 }
  0x45   :  { %240 = vmatpush3.bf16.msra.mxu0 %v261_v18 }
  0xb5   :  { %v47_v5 = vpop.xlane.xlu0 %46 }
  0xb6   :  { %v50_v6 = vmul.f32 0.03125, %v47_v5 }
  0xb8   :  { %v52_v7 = vsub.f32 %v44_v0, %v50_v6  ;;  %v60_v19 = vmul.f32 %v50_v6, %v50_v6 }
  0xb9   :  { %v49_v8 = vpop.xlane.xlu0 %48 }
  0xba   :  { %v51_v9 = vmul.f32 0.03125, %v49_v8  ;;  %v54_v10 = vmul.f32 %v52_v7, %v52_v7  ;;  %v62_v21 = vmul.f32 96.0, %v60_v19 }
  0xbc   :  { %v53_v11 = vsub.f32 %v45_v1, %v51_v9  ;;  %56 = vadd.xlane.f32.xlu1 %v54_v10  ;;  %v61_v20 = vmul.f32 %v51_v9, %v51_v9 }
  0xbe   :  { %v55_v12 = vmul.f32 %v53_v11, %v53_v11  ;;  %v63_v24 = vmul.f32 96.0, %v61_v20 }
  0xc0   :  { %58 = vadd.xlane.f32.xlu1 %v55_v12 }
 0x149   :  { %v57_v22 = vpop.xlane.xlu1 %56 }
 0x14a   :  { %v64_v23 = vsub.f32 %v57_v22, %v62_v21 }
 0x14c   :  { %v66_v25 = vmul.f32 0.03125, %v64_v23 }
 0x14d   :  { %v59_v26 = vpop.xlane.xlu1 %58 }
 0x14e   :  { %v68_v27 = vadd.f32 1e-05, %v66_v25  ;;  %v65_v28 = vsub.f32 %v59_v26, %v63_v24 }
 0x150   :  { %v67_v29 = vmul.f32 0.03125, %v65_v28  ;;  %262 = vrsqrt.f32 %v68_v27 }
 0x152   :  { %v69_v30 = vadd.f32 1e-05, %v67_v29 }
 0x154   :  { %264 = vrsqrt.f32 %v69_v30 }
 0x15a   :  { %v263_v31 = vpop.eup %262 }
 0x15b   :  { %v72_v33 = vmul.f32 %v263_v31, %v52_v7 }
 0x15e   :  { %v265_v32 = vpop.eup %264 }
 0x15f   :  { %v73_v34 = vmul.f32 %v265_v32, %v53_v11 }
 0x161   :  { %v74_v35 = vpack.c.bf16 %v73_v34, %v72_v33 }
 0x163   :  { %242 = vmatmul.mubr.bf16.vlgmr.msra.gmra.mrb[0].mxu0 %v74_v35 }
 0x236   :  { %v180_v37 = vpop.f32.mrb[0].mxu0 }
 0x237   :  { %v181_v38 = vadd.f32 %v207_v36, %v180_v37  ;;  %v243_v39 = vpop.f32.mrb[1].mxu0 }
 0x238   :  { %v183_v40 = vpop.f32.mrb[2].mxu0 }
 0x239   :  { %187 = vst [vmem:[#allocation7] sm:$0xff] %v181_v38  ;;  %v184_v41 = vadd.f32 %v207_v36, %v183_v40  ;;  %v244_v42 = vpop.f32.mrb[3].mxu0 }
 0x23b   :  { %188 = vst [vmem:[#allocation7 + $0x8] sm:$0xff] %v184_v41 }
 0x23c   :  { %321 = shalt.err (!%p318_p6)
}
 0x23d   :  { %s322_s17 = scalar_lea.hbm %s415_s3, 256 }
 0x23e   :  { %p323_p7 = scmp.ne.s32.totalorder %s415_s3, %s322_s17  ;;  %p326_p8 = scmp.lt.u32.totalorder %s322_s17, %s415_s3 }
 0x240   :  { %p328_p9 = pnand %p326_p8, %p323_p7 }
 0x242   :  { %331 = shalt.err (!%p328_p9)
}
 0x243   :  { %200 = dma.vmem_to_hbm [thread:$0]  %s195_s14, 256, %s415_s3, [#allocation4], %s339_s22, %s339_s22, %s340_s23  }
 0x244   :  { %336 = dma.done.wait [#allocation4], 256  }
 0x245   :  { %337 = vsyncadd [#allocation4], 4294967040 }
 0x246   :  { %204 = vsyncpa [#allocation3], 1 }
 0x247   :  { %205 = vsyncpa [#allocation6], 1 }
 0x248   :  { %206 = vsyncpa [#allocation4], 1 }

</bundles_post_ra>
